<compile_context>
chip_gen: v7x
topology: tpu7x:2x2x1
jax: 0.10.0
libtpu: 0.0.40
codegen_flags: <defaults>
</compile_context>

<pallas_src>
import functools

import jax
import jax.numpy as jnp
from jax.experimental import pallas as pl
from jax.experimental.pallas import tpu as pltpu


def _round_up(x: int, m: int) -> int:
    return ((x + m - 1) // m) * m


def _leaky_relu(x, slope=0.2):
    return jnp.where(x > 0, x, slope * x)


def vae_encoder_kernel(x_ref,
                       w1_ref, b1_ref,
                       w2_ref, b2_ref,
                       wmv_ref, bmv_ref,
                       out_ref,
                       *, use_tanh: bool):
    # FC_input + LeakyReLU
    h = jnp.dot(x_ref[...], w1_ref[...], preferred_element_type=jnp.float32) + b1_ref[...]
    h = _leaky_relu(h)

    # FC_input2 + LeakyReLU
    h = jnp.dot(h, w2_ref[...], preferred_element_type=jnp.float32) + b2_ref[...]
    h = _leaky_relu(h)

    # fused [mean | log_var] head: single MXU pass, lane-dense output slab
    mv = jnp.dot(h, wmv_ref[...], preferred_element_type=jnp.float32) + bmv_ref[...]
    if use_tanh:
        mv = jnp.tanh(mv)

    out_ref[...] = mv.astype(out_ref.dtype)


def vae_encoder(x, params, *, tanh: bool = False, max_tile_b: int = 512):
    """x: (B, input_dim) f32. params: (in,out)-layout weights, (1,out) biases."""
    B, input_dim = x.shape
    hidden_dim = params["w1"].shape[1]
    latent_dim = params["wm"].shape[1]

    # --- lane-dense padding of feature dims ---------------------------------
    in_pad = _round_up(input_dim, 128)
    hid_pad = _round_up(hidden_dim, 128)
    out_dim = 2 * latent_dim                  # fused [mean | log_var]
    out_pad = _round_up(out_dim, 128)

    # --- batch tiling: as large as reasonable, multiple of 8 ----------------
    tile_b = min(_round_up(B, 8), max_tile_b)
    B_pad = _round_up(B, tile_b)
    grid = (B_pad // tile_b,)

    f32 = jnp.float32

    def pad2(a, rows, cols):
        a = jnp.asarray(a, f32)
        return jnp.pad(a, ((0, rows - a.shape[0]), (0, cols - a.shape[1])))

    x_p = pad2(x, B_pad, in_pad)
    w1 = pad2(params["w1"], in_pad, hid_pad)
    b1 = pad2(params["b1"], 1, hid_pad)
    w2 = pad2(params["w2"], hid_pad, hid_pad)
    b2 = pad2(params["b2"], 1, hid_pad)
    wmv = pad2(jnp.concatenate([params["wm"], params["wv"]], axis=1), hid_pad, out_pad)
    bmv = pad2(jnp.concatenate([params["bm"], params["bv"]], axis=1), 1, out_pad)

    # --- VMEM budget (double-buffered tiles + invariant weights) ------------
    bpe = 4
    weight_bytes = (in_pad * hid_pad + hid_pad * hid_pad + hid_pad * out_pad
                    + 2 * hid_pad + out_pad) * bpe
    io_bytes = (tile_b * in_pad + tile_b * out_pad) * bpe
    interm_bytes = 2 * tile_b * hid_pad * bpe
    est = 2 * (weight_bytes + io_bytes) + interm_bytes
    vmem_limit = int(min(max(2 * est, 16 * 1024 * 1024), 48 * 1024 * 1024))

    # x / output tiled over batch; weights & biases are grid-invariant blocks
    # (constant index_map -> Pallas does not re-fetch them between steps).
    const2 = lambda i: (0, 0)
    in_specs = [
        pl.BlockSpec((tile_b, in_pad), lambda i: (i, 0)),   # x
        pl.BlockSpec((in_pad, hid_pad), const2),            # FC_input W
        pl.BlockSpec((1, hid_pad), const2),                 # FC_input b
        pl.BlockSpec((hid_pad, hid_pad), const2),           # FC_input2 W
        pl.BlockSpec((1, hid_pad), const2),                 # FC_input2 b
        pl.BlockSpec((hid_pad, out_pad), const2),           # fused mean|var W
        pl.BlockSpec((1, out_pad), const2),                 # fused mean|var b
    ]
    out_specs = pl.BlockSpec((tile_b, out_pad), lambda i: (i, 0))

    out = pl.pallas_call(
        functools.partial(vae_encoder_kernel, use_tanh=tanh),
        out_shape=jax.ShapeDtypeStruct((B_pad, out_pad), jnp.float32),
        grid_spec=pltpu.PrefetchScalarGridSpec(
            num_scalar_prefetch=0,
            grid=grid,
            in_specs=in_specs,
            out_specs=out_specs,
        ),
        compiler_params=pltpu.CompilerParams(
            dimension_semantics=("parallel",),
            vmem_limit_bytes=vmem_limit,
        ),
    )(x_p, w1, b1, w2, b2, wmv, bmv)

    mean = out[:B, :latent_dim]
    log_var = out[:B, latent_dim:out_dim]
    return mean, log_var


def init_params(key, input_dim, hidden_dim, latent_dim):
    """Deterministic synthetic parameters (PyTorch-Linear-style uniform init)."""
    ks = jax.random.split(key, 8)

    def linear(kw, kb, fan_in, fan_out):
        bound = 1.0 / (fan_in ** 0.5)
        w = jax.random.uniform(kw, (fan_in, fan_out), jnp.float32, -bound, bound)
        b = jax.random.uniform(kb, (1, fan_out), jnp.float32, -bound, bound)
        return w, b

    w1, b1 = linear(ks[0], ks[1], input_dim, hidden_dim)
    w2, b2 = linear(ks[2], ks[3], hidden_dim, hidden_dim)
    wm, bm = linear(ks[4], ks[5], hidden_dim, latent_dim)
    wv, bv = linear(ks[6], ks[7], hidden_dim, latent_dim)
    return dict(w1=w1, b1=b1, w2=w2, b2=b2, wm=wm, bm=bm, wv=wv, bv=bv)


def vae_encoder_ref(x, p, tanh=False):
    """Pure-JAX reference mirroring VAEEncoder.forward."""
    h = x @ p["w1"] + p["b1"]
    h = jnp.where(h > 0, h, 0.2 * h)
    h = h @ p["w2"] + p["b2"]
    h = jnp.where(h > 0, h, 0.2 * h)
    mean = h @ p["wm"] + p["bm"]
    logv = h @ p["wv"] + p["bv"]
    if tanh:
        mean, logv = jnp.tanh(mean), jnp.tanh(logv)
    return mean, logv


if __name__ == "__main__":
    key = jax.random.PRNGKey(0)
    k_x, k_p = jax.random.split(key)

    B, INPUT_DIM, HIDDEN_DIM, LATENT_DIM = 16, 32, 64, 16

    x = jax.random.normal(k_x, (B, INPUT_DIM), jnp.float32)
    params = init_params(k_p, INPUT_DIM, HIDDEN_DIM, LATENT_DIM)

    # tanh=False branch
    mean, log_var = vae_encoder(x, params, tanh=False)
    mean = jax.block_until_ready(mean)
    log_var = jax.block_until_ready(log_var)
    mean_ref, logv_ref = vae_encoder_ref(x, params, tanh=False)
    assert mean.shape == (B, LATENT_DIM) and log_var.shape == (B, LATENT_DIM)
    assert jnp.allclose(mean, mean_ref, atol=1e-4, rtol=1e-4)
    assert jnp.allclose(log_var, logv_ref, atol=1e-4, rtol=1e-4)

    # tanh=True branch
    mt, lt = vae_encoder(x, params, tanh=True)
    jax.block_until_ready(mt)
    jax.block_until_ready(lt)
    mt_ref, lt_ref = vae_encoder_ref(x, params, tanh=True)
    assert jnp.allclose(mt, mt_ref, atol=1e-4, rtol=1e-4)
    assert jnp.allclose(lt, lt_ref, atol=1e-4, rtol=1e-4)

    print("KERNEL_OK")
</pallas_src>

<mosaic_0001>
module attributes {stable_mosaic.version = 11 : i64} {
  func.func @vae_encoder_kernel(%arg0: i32, %arg1: memref<16x128xf32, #tpu.memory_space<vmem>>, %arg2: memref<128x128xf32, #tpu.memory_space<vmem>>, %arg3: memref<1x128xf32, #tpu.memory_space<vmem>>, %arg4: memref<128x128xf32, #tpu.memory_space<vmem>>, %arg5: memref<1x128xf32, #tpu.memory_space<vmem>>, %arg6: memref<128x128xf32, #tpu.memory_space<vmem>>, %arg7: memref<1x128xf32, #tpu.memory_space<vmem>>, %arg8: memref<16x128xf32, #tpu.memory_space<vmem>>) attributes {dimension_semantics = [#tpu.dimension_semantics<parallel>], iteration_bounds = array<i64: 1>, scalar_prefetch = 0 : i64, scratch_operands = 0 : i64, tpu.core_type = #tpu.core_type<tc>, window_params = [{transform_indices = @transform_0, window_bounds = array<i64: 16, 128>}, {pipeline_mode = #tpu.pipeline_mode<synchronous>, transform_indices = @transform_1, window_bounds = array<i64: 128, 128>}, {pipeline_mode = #tpu.pipeline_mode<synchronous>, transform_indices = @transform_2, window_bounds = array<i64: 1, 128>}, {pipeline_mode = #tpu.pipeline_mode<synchronous>, transform_indices = @transform_3, window_bounds = array<i64: 128, 128>}, {pipeline_mode = #tpu.pipeline_mode<synchronous>, transform_indices = @transform_4, window_bounds = array<i64: 1, 128>}, {pipeline_mode = #tpu.pipeline_mode<synchronous>, transform_indices = @transform_5, window_bounds = array<i64: 128, 128>}, {pipeline_mode = #tpu.pipeline_mode<synchronous>, transform_indices = @transform_6, window_bounds = array<i64: 1, 128>}, {transform_indices = @transform_7, window_bounds = array<i64: 16, 128>}]} {
    %c0 = arith.constant 0 : index
    %c0_0 = arith.constant 0 : index
    %0 = vector.load %arg1[%c0, %c0_0] : memref<16x128xf32, #tpu.memory_space<vmem>>, vector<16x128xf32>
    %c0_1 = arith.constant 0 : index
    %c0_2 = arith.constant 0 : index
    %1 = vector.load %arg2[%c0_1, %c0_2] : memref<128x128xf32, #tpu.memory_space<vmem>>, vector<128x128xf32>
    %cst = arith.constant dense<0.000000e+00> : vector<16x128xf32>
    %2 = tpu.matmul %0, %1, %cst {dimension_numbers = #tpu.dot_dimension_numbers<[1], [0], [0], [1], [0, 0, 1, 1], [], []>} : vector<16x128xf32>, vector<128x128xf32>, vector<16x128xf32> -> vector<16x128xf32>
    %c0_3 = arith.constant 0 : index
    %c0_4 = arith.constant 0 : index
    %3 = vector.load %arg3[%c0_3, %c0_4] : memref<1x128xf32, #tpu.memory_space<vmem>>, vector<1x128xf32>
    %4 = vector.broadcast %3 : vector<1x128xf32> to vector<16x128xf32>
    %5 = arith.addf %2, %4 : vector<16x128xf32>
    %cst_5 = arith.constant 0.000000e+00 : f32
    %6 = vector.broadcast %cst_5 : f32 to vector<16x128xf32>
    %7 = arith.cmpf ogt, %5, %6 : vector<16x128xf32>
    %cst_6 = arith.constant 2.000000e-01 : f32
    %8 = vector.broadcast %cst_6 : f32 to vector<16x128xf32>
    %9 = arith.mulf %8, %5 : vector<16x128xf32>
    %10 = arith.select %7, %5, %9 : vector<16x128xi1>, vector<16x128xf32>
    %c0_7 = arith.constant 0 : index
    %c0_8 = arith.constant 0 : index
    %11 = vector.load %arg4[%c0_7, %c0_8] : memref<128x128xf32, #tpu.memory_space<vmem>>, vector<128x128xf32>
    %cst_9 = arith.constant dense<0.000000e+00> : vector<16x128xf32>
    %12 = tpu.matmul %10, %11, %cst_9 {dimension_numbers = #tpu.dot_dimension_numbers<[1], [0], [0], [1], [0, 0, 1, 1], [], []>} : vector<16x128xf32>, vector<128x128xf32>, vector<16x128xf32> -> vector<16x128xf32>
    %c0_10 = arith.constant 0 : index
    %c0_11 = arith.constant 0 : index
    %13 = vector.load %arg5[%c0_10, %c0_11] : memref<1x128xf32, #tpu.memory_space<vmem>>, vector<1x128xf32>
    %14 = vector.broadcast %13 : vector<1x128xf32> to vector<16x128xf32>
    %15 = arith.addf %12, %14 : vector<16x128xf32>
    %cst_12 = arith.constant 0.000000e+00 : f32
    %16 = vector.broadcast %cst_12 : f32 to vector<16x128xf32>
    %17 = arith.cmpf ogt, %15, %16 : vector<16x128xf32>
    %cst_13 = arith.constant 2.000000e-01 : f32
    %18 = vector.broadcast %cst_13 : f32 to vector<16x128xf32>
    %19 = arith.mulf %18, %15 : vector<16x128xf32>
    %20 = arith.select %17, %15, %19 : vector<16x128xi1>, vector<16x128xf32>
    %c0_14 = arith.constant 0 : index
    %c0_15 = arith.constant 0 : index
    %21 = vector.load %arg6[%c0_14, %c0_15] : memref<128x128xf32, #tpu.memory_space<vmem>>, vector<128x128xf32>
    %cst_16 = arith.constant dense<0.000000e+00> : vector<16x128xf32>
    %22 = tpu.matmul %20, %21, %cst_16 {dimension_numbers = #tpu.dot_dimension_numbers<[1], [0], [0], [1], [0, 0, 1, 1], [], []>} : vector<16x128xf32>, vector<128x128xf32>, vector<16x128xf32> -> vector<16x128xf32>
    %c0_17 = arith.constant 0 : index
    %c0_18 = arith.constant 0 : index
    %23 = vector.load %arg7[%c0_17, %c0_18] : memref<1x128xf32, #tpu.memory_space<vmem>>, vector<1x128xf32>
    %24 = vector.broadcast %23 : vector<1x128xf32> to vector<16x128xf32>
    %25 = arith.addf %22, %24 : vector<16x128xf32>
    %c0_19 = arith.constant 0 : index
    %c0_20 = arith.constant 0 : index
    %26 = vector.load %arg8[%c0_19, %c0_20] : memref<16x128xf32, #tpu.memory_space<vmem>>, vector<16x128xf32>
    tpu.vector_store %arg8[%c0_19, %c0_20], %25 {strides = array<i32>} : memref<16x128xf32, #tpu.memory_space<vmem>>, vector<16x128xf32>,
    return
  }
  func.func @transform_0(%arg0: i32) -> (i32, i32) {
    %c0_i32 = arith.constant 0 : i32
    %c0_i32_0 = arith.constant 0 : i32
    return %arg0, %c0_i32 : i32, i32
  }
  func.func @transform_1(%arg0: i32) -> (i32, i32) {
    %c0_i32 = arith.constant 0 : i32
    %c0_i32_0 = arith.constant 0 : i32
    %c0_i32_1 = arith.constant 0 : i32
    return %c0_i32, %c0_i32_0 : i32, i32
  }
  func.func @transform_2(%arg0: i32) -> (i32, i32) {
    %c0_i32 = arith.constant 0 : i32
    %c0_i32_0 = arith.constant 0 : i32
    %c0_i32_1 = arith.constant 0 : i32
    return %c0_i32, %c0_i32_0 : i32, i32
  }
  func.func @transform_3(%arg0: i32) -> (i32, i32) {
    %c0_i32 = arith.constant 0 : i32
    %c0_i32_0 = arith.constant 0 : i32
    %c0_i32_1 = arith.constant 0 : i32
    return %c0_i32, %c0_i32_0 : i32, i32
  }
  func.func @transform_4(%arg0: i32) -> (i32, i32) {
    %c0_i32 = arith.constant 0 : i32
    %c0_i32_0 = arith.constant 0 : i32
    %c0_i32_1 = arith.constant 0 : i32
    return %c0_i32, %c0_i32_0 : i32, i32
  }
  func.func @transform_5(%arg0: i32) -> (i32, i32) {
    %c0_i32 = arith.constant 0 : i32
    %c0_i32_0 = arith.constant 0 : i32
    %c0_i32_1 = arith.constant 0 : i32
    return %c0_i32, %c0_i32_0 : i32, i32
  }
  func.func @transform_6(%arg0: i32) -> (i32, i32) {
    %c0_i32 = arith.constant 0 : i32
    %c0_i32_0 = arith.constant 0 : i32
    %c0_i32_1 = arith.constant 0 : i32
    return %c0_i32, %c0_i32_0 : i32, i32
  }
  func.func @transform_7(%arg0: i32) -> (i32, i32) {
    %c0_i32 = arith.constant 0 : i32
    %c0_i32_0 = arith.constant 0 : i32
    return %arg0, %c0_i32 : i32, i32
  }
}

</mosaic_0001>

<bundles_post_ra>
// kernel: tpu_custom_call.1
= control target key start
LH: loop header
LB: loop body
LE: loop exit
PB: predicated region body
PF: predicated region fallthrough
CT: control target
= control target key end

     0   :  { %12 = vsyncpa [#allocation3], 0  ;;  %s939_s0 = inlined_call_operand.hbm [shape: f32[16,128], index: 0, kind: input, shape index: {}]   ;;  %s940_s1 = inlined_call_operand.hbm [shape: f32[128,128], index: 1, kind: input, shape index: {}]   ;;  %s941_s2 = inlined_call_operand.vmem [shape: f32[1,128], index: 2, kind: input, shape index: {}]   ;;  %s942_s3 = inlined_call_operand.hbm [shape: f32[128,128], index: 3, kind: input, shape index: {}]   ;;  %s943_s4 = inlined_call_operand.vmem [shape: f32[1,128], index: 4, kind: input, shape index: {}]   ;;  %s944_s5 = inlined_call_operand.hbm [shape: f32[128,128], index: 5, kind: input, shape index: {}]   ;;  %s945_s6 = inlined_call_operand.vmem [shape: f32[1,128], index: 6, kind: input, shape index: {}]   ;;  %s946_s7 = inlined_call_operand.hbm [shape: f32[16,128], index: 7, kind: output, shape index: {}]  }
   0x1   :  { %13 = vsyncpa [#allocation6], 0 }
   0x2   :  { %14 = vsyncpa [#allocation9], 0 }
   0x3   :  { %15 = vsyncpa [#allocation4], 0  ;;  %s794_s24 = smov [#allocation5]   ;;  %s795_s26 = smov [#allocation2]  }
   0x4   :  { %s33_s25 = sshll.u32 %s794_s24, 4  ;;  %s21_s27 = sshll.u32 %s795_s26, 4  ;;  %s34_s25 = int_to_ptr.vmem [resolvable:$true] %s33_s25  ;;  %s841_s27 = int_to_ptr.vmem [resolvable:$true] %s21_s27 }
   0x5   :  { %s676_s30 = scalar_lea.hbm %s940_s1, 2048 }
   0x6   :  { %p677_p0 = scmp.ne.s32.totalorder %s940_s1, %s676_s30  ;;  %p680_p1 = scmp.lt.u32.totalorder %s676_s30, %s940_s1 }
   0x8   :  { %p682_p2 = pnand %p680_p1, %p677_p0 }
   0xa   :  { %685 = shalt.err (!%p682_p2)
}
   0xb   :  { %s686_s12 = scalar_lea.vmem %s34_s25, 2048  ;;  %p691_p4 = scmp.lt.s32.totalorder %s34_s25, %s34_s25 }
   0xc   :  { %p687_p3 = scmp.ne.s32.totalorder %s34_s25, %s686_s12  ;;  %p692_p5 = scmp.lt.s32.totalorder %s686_s12, %s686_s12 }
   0xe   :  { %p693_p6 = por %p692_p5, %p691_p4 }
  0x10   :  { %p694_p7 = pnand %p693_p6, %p687_p3 }
  0x12   :  { %697 = shalt.err (!%p694_p7)
}
  0x13   :  { %s796_s13 = smov 128   ;;  %s797_s14 = smov 8  }
  0x14   :  { %39 = dma.hbm_to_vmem [thread:$0]  %s940_s1, 2048, %s34_s25, [#allocation6], %s796_s13, %s796_s13, %s797_s14  }
  0x15   :  { %s698_s19 = scalar_lea.hbm %s939_s0, 256 }
  0x16   :  { %p699_p8 = scmp.ne.s32.totalorder %s939_s0, %s698_s19  ;;  %p702_p9 = scmp.lt.u32.totalorder %s698_s19, %s939_s0 }
  0x18   :  { %p704_p10 = pnand %p702_p9, %p699_p8 }
  0x1a   :  { %707 = shalt.err (!%p704_p10)
}
  0x1b   :  { %s708_s24 = scalar_lea.vmem %s841_s27, 256  ;;  %p713_p12 = scmp.lt.s32.totalorder %s841_s27, %s841_s27 }
  0x1c   :  { %p709_p11 = scmp.ne.s32.totalorder %s841_s27, %s708_s24  ;;  %p714_p13 = scmp.lt.s32.totalorder %s708_s24, %s708_s24 }
  0x1e   :  { %p715_p0 = por %p714_p13, %p713_p12 }
  0x20   :  { %p716_p1 = pnand %p715_p0, %p709_p11 }
  0x22   :  { %719 = shalt.err (!%p716_p1)
}
  0x23   :  { %27 = dma.hbm_to_vmem [thread:$0]  %s939_s0, 256, %s841_s27, [#allocation3], %s796_s13, %s796_s13, %s797_s14  }
  0x24   :  { %s798_s26 = smov [#allocation7]   ;;  %s799_s29 = smov [#allocation8]  }
  0x25   :  { %s47_s28 = sshll.u32 %s798_s26, 4  ;;  %s61_s30 = sshll.u32 %s799_s29, 4  ;;  %s48_s28 = int_to_ptr.vmem [resolvable:$true] %s47_s28  ;;  %s878_s30 = int_to_ptr.vmem [resolvable:$true] %s61_s30 }
  0x26   :  { %s720_s10 = scalar_lea.hbm %s942_s3, 2048 }
  0x27   :  { %p721_p2 = scmp.ne.s32.totalorder %s942_s3, %s720_s10  ;;  %p724_p3 = scmp.lt.u32.totalorder %s720_s10, %s942_s3 }
  0x29   :  { %p726_p4 = pnand %p724_p3, %p721_p2 }
  0x2b   :  { %729 = shalt.err (!%p726_p4)
}
  0x2c   :  { %s730_s0 = scalar_lea.vmem %s48_s28, 2048  ;;  %p735_p6 = scmp.lt.s32.totalorder %s48_s28, %s48_s28 }
  0x2d   :  { %p731_p5 = scmp.ne.s32.totalorder %s48_s28, %s730_s0  ;;  %p736_p7 = scmp.lt.s32.totalorder %s730_s0, %s730_s0 }
  0x2f   :  { %p737_p8 = por %p736_p7, %p735_p6 }
  0x31   :  { %p738_p9 = pnand %p737_p8, %p731_p5 }
  0x33   :  { %741 = shalt.err (!%p738_p9)
}
  0x34   :  { %53 = dma.hbm_to_vmem [thread:$0]  %s942_s3, 2048, %s48_s28, [#allocation6], %s796_s13, %s796_s13, %s797_s14  }
  0x35   :  { %s742_s20 = scalar_lea.hbm %s944_s5, 2048 }
  0x36   :  { %p743_p10 = scmp.ne.s32.totalorder %s944_s5, %s742_s20  ;;  %p746_p11 = scmp.lt.u32.totalorder %s742_s20, %s944_s5 }
  0x38   :  { %p748_p12 = pnand %p746_p11, %p743_p10 }
  0x3a   :  { %751 = shalt.err (!%p748_p12)
}
  0x3b   :  { %s752_s1 = scalar_lea.vmem %s878_s30, 2048  ;;  %p757_p0 = scmp.lt.s32.totalorder %s878_s30, %s878_s30 }
  0x3c   :  { %p753_p13 = scmp.ne.s32.totalorder %s878_s30, %s752_s1  ;;  %p758_p1 = scmp.lt.s32.totalorder %s752_s1, %s752_s1 }
  0x3e   :  { %p759_p2 = por %p758_p1, %p757_p0 }
  0x40   :  { %p760_p3 = pnand %p759_p2, %p753_p13 }
  0x42   :  { %763 = shalt.err (!%p760_p3)
}
  0x43   :  { %67 = dma.hbm_to_vmem [thread:$0]  %s944_s5, 2048, %s878_s30, [#allocation9], %s796_s13, %s796_s13, %s797_s14  }
  0x44   :  { %786 = dma.done.wait [#allocation3], 256  }
  0x45   :  { %787 = vsyncadd [#allocation3], 4294967040 }
  0x46   :  { %788 = dma.done.wait [#allocation6], 4096  }
  0x47   :  { %789 = vsyncadd [#allocation6], 4294963200 }
  0x48   :  { %790 = dma.done.wait [#allocation9], 2048  }
  0x49   :  { %791 = vsyncadd [#allocation9], 4294965248  ;;  %v84_v0 = vld [vmem:[#allocation5] sm:$0xff]  ;;  %v85_v1 = vld [vmem:[#allocation5 + $0x8] sm:$0xff]  ;;  %s800_s8 = smov [#allocation10]  }
  0x4a   :  { %v86_v2 = vld [vmem:[#allocation5 + $0x10] sm:$0xff]  ;;  %v573_v3 = vpack.c.bf16 %v85_v1, %v84_v0  ;;  %v87_v4 = vld [vmem:[#allocation5 + $0x18] sm:$0xff]  ;;  %v88_v6 = vld [vmem:[#allocation5 + $0x20] sm:$0xff]  ;;  %s397_s9 = sshll.u32 %s800_s8, 4  ;;  %s398_s9 = int_to_ptr.vmem [resolvable:$true] %s397_s9 }
  0x4b   :  { %v577_v5 = vpack.c.bf16 %v87_v4, %v86_v2  ;;  %v89_v7 = vld [vmem:[#allocation5 + $0x28] sm:$0xff]  ;;  %v90_v9 = vld [vmem:[#allocation5 + $0x30] sm:$0xff]  ;;  %v91_v10 = vld [vmem:[#allocation5 + $0x38] sm:$0xff]  ;;  %p769_p5 = scmp.lt.s32.totalorder %s398_s9, %s398_s9 }
  0x4c   :  { %574 = vmatprep.subr.bf16.mxu0 %v573_v3  ;;  %v581_v8 = vpack.c.bf16 %v89_v7, %v88_v6  ;;  %v82_v11 = vld [vmem:[#allocation2] sm:$0xff]  ;;  %v188_v12 = vld [vmem:[#allocation7] sm:$0xff]  ;;  %v189_v13 = vld [vmem:[#allocation7 + $0x8] sm:$0xff]  ;;  %v585_v20 = vpack.c.bf16 %v91_v10, %v90_v9 }
  0x4d   :  { %576 = vmatpush3.bf16.msra.mxu0 %v573_v3  ;;  %500 = vmatprep.mubr.f32.mxu0 %v82_v11  ;;  %v190_v14 = vld [vmem:[#allocation7 + $0x10] sm:$0xff]  ;;  %v605_v15 = vpack.c.bf16 %v189_v13, %v188_v12  ;;  %v191_v16 = vld [vmem:[#allocation7 + $0x18] sm:$0xff]  ;;  %v192_v18 = vld [vmem:[#allocation7 + $0x20] sm:$0xff] }
  0x4e   :  { %578 = vmatprep.subr.bf16.mxu0 %v577_v5  ;;  %v609_v17 = vpack.c.bf16 %v191_v16, %v190_v14  ;;  %v193_v19 = vld [vmem:[#allocation7 + $0x28] sm:$0xff]  ;;  %v92_v21 = vld [vmem:[#allocation5 + $0x40] sm:$0xff]  ;;  %v194_v24 = vld [vmem:[#allocation7 + $0x30] sm:$0xff] }
  0x4f   :  { %606 = vmatprep.subr.bf16.mxu1 %v605_v15  ;;  %v93_v22 = vld [vmem:[#allocation5 + $0x48] sm:$0xff]  ;;  %v613_v23 = vpack.c.bf16 %v193_v19, %v192_v18  ;;  %v195_v25 = vld [vmem:[#allocation7 + $0x38] sm:$0xff]  ;;  %v94_v27 = vld [vmem:[#allocation5 + $0x50] sm:$0xff] }
  0x50   :  { %608 = vmatpush3.bf16.msra.mxu1 %v605_v15  ;;  %v589_v26 = vpack.c.bf16 %v93_v22, %v92_v21  ;;  %v95_v28 = vld [vmem:[#allocation5 + $0x58] sm:$0xff]  ;;  %v617_v29 = vpack.c.bf16 %v195_v25, %v194_v24  ;;  %v196_v30 = vld [vmem:[#allocation7 + $0x40] sm:$0xff]  ;;  %v197_v31 = vld [vmem:[#allocation7 + $0x48] sm:$0xff] }
  0x51   :  { %580 = vmatpush3.bf16.msra.mxu0 %v577_v5  ;;  %610 = vmatprep.subr.bf16.mxu1 %v609_v17  ;;  %v593_v32 = vpack.c.bf16 %v95_v28, %v94_v27  ;;  %v96_v33 = vld [vmem:[#allocation5 + $0x60] sm:$0xff]  ;;  %v97_v34 = vld [vmem:[#allocation5 + $0x68] sm:$0xff]  ;;  %v621_v35 = vpack.c.bf16 %v197_v31, %v196_v30  ;;  %v198_v36 = vld [vmem:[#allocation7 + $0x50] sm:$0xff] }
  0x52   :  { %582 = vmatprep.subr.bf16.mxu0 %v581_v8  ;;  %v199_v37 = vld [vmem:[#allocation7 + $0x58] sm:$0xff]  ;;  %v597_v38 = vpack.c.bf16 %v97_v34, %v96_v33  ;;  %v98_v39 = vld [vmem:[#allocation5 + $0x70] sm:$0xff]  ;;  %v200_v44 = vld [vmem:[#allocation7 + $0x60] sm:$0xff] }
  0x53   :  { %v99_v40 = vld [vmem:[#allocation5 + $0x78] sm:$0xff]  ;;  %v625_v41 = vpack.c.bf16 %v199_v37, %v198_v36  ;;  %v201_v45 = vld [vmem:[#allocation7 + $0x68] sm:$0xff]  ;;  %v202_v47 = vld [vmem:[#allocation7 + $0x70] sm:$0xff] }
  0x54   :  { %612 = vmatpush3.bf16.msra.mxu1 %v609_v17  ;;  %v601_v42 = vpack.c.bf16 %v99_v40, %v98_v39  ;;  %v83_v43 = vld [vmem:[#allocation2 + $0x8] sm:$0xff]  ;;  %v629_v46 = vpack.c.bf16 %v201_v45, %v200_v44  ;;  %v292_v50 = vld [vmem:[#allocation8] sm:$0xff]  ;;  %v293_v51 = vld [vmem:[#allocation8 + $0x8] sm:$0xff] }
  0x55   :  { %584 = vmatpush3.bf16.msra.mxu0 %v581_v8  ;;  %614 = vmatprep.subr.bf16.mxu1 %v613_v23  ;;  %v203_v48 = vld [vmem:[#allocation7 + $0x78] sm:$0xff]  ;;  %v294_v52 = vld [vmem:[#allocation8 + $0x10] sm:$0xff]  ;;  %v637_v53 = vpack.c.bf16 %v293_v51, %v292_v50  ;;  %v296_v56 = vld [vmem:[#allocation8 + $0x20] sm:$0xff] }
  0x56   :  { %586 = vmatprep.subr.bf16.mxu0 %v585_v20  ;;  %v633_v49 = vpack.c.bf16 %v203_v48, %v202_v47  ;;  %v295_v54 = vld [vmem:[#allocation8 + $0x18] sm:$0xff]  ;;  %v297_v57 = vld [vmem:[#allocation8 + $0x28] sm:$0xff]  ;;  %v298_v59 = vld [vmem:[#allocation8 + $0x30] sm:$0xff] }
  0x57   :  { %v641_v55 = vpack.c.bf16 %v295_v54, %v294_v52  ;;  %v645_v58 = vpack.c.bf16 %v297_v57, %v296_v56  ;;  %v299_v60 = vld [vmem:[#allocation8 + $0x38] sm:$0xff]  ;;  %v300_v62 = vld [vmem:[#allocation8 + $0x40] sm:$0xff]  ;;  %v301_v63 = vld [vmem:[#allocation8 + $0x48] sm:$0xff] }
  0x58   :  { %616 = vmatpush3.bf16.msra.mxu1 %v613_v23  ;;  %v649_v61 = vpack.c.bf16 %v299_v60, %v298_v59  ;;  %v653_v0 = vpack.c.bf16 %v301_v63, %v300_v62  ;;  %v302_v1 = vld [vmem:[#allocation8 + $0x50] sm:$0xff]  ;;  %v303_v2 = vld [vmem:[#allocation8 + $0x58] sm:$0xff]  ;;  %v304_v13 = vld [vmem:[#allocation8 + $0x60] sm:$0xff] }
  0x59   :  { %588 = vmatpush3.bf16.msra.mxu0 %v585_v20  ;;  %618 = vmatprep.subr.bf16.mxu1 %v617_v29  ;;  %v657_v3 = vpack.c.bf16 %v303_v2, %v302_v1  ;;  %v411_v4 = vld [vmem:[%s941_s2] ss:$0 sm:$0xff]  ;;  %v305_v14 = vld [vmem:[#allocation8 + $0x68] sm:$0xff]  ;;  %v307_v17 = vld [vmem:[#allocation8 + $0x78] sm:$0xff] }
  0x5a   :  { %590 = vmatprep.subr.bf16.mxu0 %v589_v26  ;;  %v661_v15 = vpack.c.bf16 %v305_v14, %v304_v13  ;;  %v306_v16 = vld [vmem:[#allocation8 + $0x70] sm:$0xff] }
  0x5b   :  { %v665_v18 = vpack.c.bf16 %v307_v17, %v306_v16  ;;  %v412_v19 = vld [vmem:[%s943_s4] ss:$0 sm:$0xff]  ;;  %s764_s4 = scalar_lea.vmem %s398_s9, 256 }
  0x5c   :  { %620 = vmatpush3.bf16.msra.mxu1 %v617_v29  ;;  %v413_v28 = vld [vmem:[%s945_s6] ss:$0 sm:$0xff]  ;;  %p765_p4 = scmp.ne.s32.totalorder %s398_s9, %s764_s4  ;;  %p770_p6 = scmp.lt.s32.totalorder %s764_s4, %s764_s4 }
  0x5d   :  { %592 = vmatpush3.bf16.msra.mxu0 %v589_v26  ;;  %622 = vmatprep.subr.bf16.mxu1 %v621_v35 }
  0x5e   :  { %594 = vmatprep.subr.bf16.mxu0 %v593_v32  ;;  %p771_p7 = por %p770_p6, %p769_p5 }
  0x60   :  { %624 = vmatpush3.bf16.msra.mxu1 %v621_v35  ;;  %p772_p8 = pnand %p771_p7, %p765_p4 }
  0x61   :  { %596 = vmatpush3.bf16.msra.mxu0 %v593_v32  ;;  %626 = vmatprep.subr.bf16.mxu1 %v625_v41 }
  0x62   :  { %598 = vmatprep.subr.bf16.mxu0 %v597_v38 }
  0x64   :  { %628 = vmatpush3.bf16.msra.mxu1 %v625_v41 }
  0x65   :  { %600 = vmatpush3.bf16.msra.mxu0 %v597_v38  ;;  %630 = vmatprep.subr.bf16.mxu1 %v629_v46 }
  0x66   :  { %602 = vmatprep.subr.bf16.mxu0 %v601_v42 }
  0x68   :  { %632 = vmatpush3.bf16.msra.mxu1 %v629_v46 }
  0x69   :  { %604 = vmatpush3.bf16.msra.mxu0 %v601_v42  ;;  %634 = vmatprep.subr.bf16.mxu1 %v633_v49 }
  0x6a   :  { %638 = vmatprep.subr.bf16.mxu0 %v637_v53 }
  0x6c   :  { %501 = vmatmul.mubr.f32.vlgmr.msra.gmra.mrb[0].mxu0 %v83_v43  ;;  %636 = vmatpush3.bf16.msra.mxu1 %v633_v49 }
  0x6d   :  { %640 = vmatpush3.bf16.msra.mxu0 %v637_v53 }
  0x6e   :  { %642 = vmatprep.subr.bf16.mxu0 %v641_v55 }
  0x71   :  { %644 = vmatpush3.bf16.msra.mxu0 %v641_v55 }
  0x72   :  { %646 = vmatprep.subr.bf16.mxu0 %v645_v58 }
  0x75   :  { %648 = vmatpush3.bf16.msra.mxu0 %v645_v58 }
  0x76   :  { %650 = vmatprep.subr.bf16.mxu0 %v649_v61 }
  0x79   :  { %652 = vmatpush3.bf16.msra.mxu0 %v649_v61 }
  0x7a   :  { %654 = vmatprep.subr.bf16.mxu0 %v653_v0 }
  0x7d   :  { %656 = vmatpush3.bf16.msra.mxu0 %v653_v0 }
  0x7e   :  { %658 = vmatprep.subr.bf16.mxu0 %v657_v3 }
  0x81   :  { %660 = vmatpush3.bf16.msra.mxu0 %v657_v3 }
  0x82   :  { %662 = vmatprep.subr.bf16.mxu0 %v661_v15 }
  0x85   :  { %664 = vmatpush3.bf16.msra.mxu0 %v661_v15 }
  0x86   :  { %666 = vmatprep.subr.bf16.mxu0 %v665_v18 }
  0x89   :  { %668 = vmatpush3.bf16.msra.mxu0 %v665_v18 }
 0x13f   :  { %v502_v5 = vpop.f32.mrb[0].mxu0 }
 0x140   :  { %v179_v6 = vadd.f32 %v502_v5, %v411_v4  ;;  %v173_v7 = vpop.f32.mrb[1].mxu0 }
 0x141   :  { %v174_v8 = vadd.f32 %v411_v4, %v173_v7 }
 0x142   :  { %v185_v9 = vmul.f32 0.2, %v179_v6  ;;  %vm183_vm1 = vcmp.gt.f32.partialorder %v179_v6, 0.0 }
 0x143   :  { %vm182_vm0 = vcmp.gt.f32.partialorder %v174_v8, 0.0  ;;  %v184_v10 = vmul.f32 0.2, %v174_v8 }
 0x144   :  { %v187_v12 = vsel %vm183_vm1, %v179_v6, %v185_v9 }
 0x145   :  { %v186_v11 = vsel %vm182_vm0, %v174_v8, %v184_v10 }
 0x146   :  { %535 = vmatprep.mubr.f32.mxu1 %v186_v11 }
 0x147   :  { %536 = vmatmul.mubr.f32.vlgmr.msra.gmra.mrb[0].mxu1 %v187_v12 }
 0x21a   :  { %v537_v20 = vpop.f32.mrb[0].mxu1 }
 0x21b   :  { %v283_v21 = vadd.f32 %v537_v20, %v412_v19  ;;  %v277_v22 = vpop.f32.mrb[1].mxu1 }
 0x21c   :  { %v278_v23 = vadd.f32 %v412_v19, %v277_v22 }
 0x21d   :  { %v289_v24 = vmul.f32 0.2, %v283_v21  ;;  %vm287_vm2 = vcmp.gt.f32.partialorder %v283_v21, 0.0 }
 0x21e   :  { %v288_v25 = vmul.f32 0.2, %v278_v23  ;;  %vm286_vm3 = vcmp.gt.f32.partialorder %v278_v23, 0.0 }
 0x21f   :  { %v291_v27 = vsel %vm287_vm2, %v283_v21, %v289_v24 }
 0x220   :  { %v290_v26 = vsel %vm286_vm3, %v278_v23, %v288_v25 }
 0x221   :  { %570 = vmatprep.mubr.f32.mxu0 %v290_v26 }
 0x222   :  { %571 = vmatmul.mubr.f32.vlgmr.msra.gmra.mrb[2].mxu0 %v291_v27 }
 0x2f5   :  { %v572_v29 = vpop.f32.mrb[2].mxu0 }
 0x2f6   :  { %v387_v30 = vadd.f32 %v572_v29, %v413_v28  ;;  %v381_v31 = vpop.f32.mrb[3].mxu0 }
 0x2f7   :  { %v382_v32 = vadd.f32 %v413_v28, %v381_v31 }
 0x2f8   :  { %391 = vst [vmem:[#allocation10 + $0x8] sm:$0xff] %v387_v30 }
 0x2f9   :  { %390 = vst [vmem:[#allocation10] sm:$0xff] %v382_v32 }
 0x2fa   :  { %775 = shalt.err (!%p772_p8)
}
 0x2fb   :  { %s776_s6 = scalar_lea.hbm %s946_s7, 256 }
 0x2fc   :  { %p777_p9 = scmp.ne.s32.totalorder %s946_s7, %s776_s6  ;;  %p780_p10 = scmp.lt.u32.totalorder %s776_s6, %s946_s7 }
 0x2fe   :  { %p782_p11 = pnand %p780_p10, %p777_p9 }
 0x300   :  { %785 = shalt.err (!%p782_p11)
}
 0x301   :  { %403 = dma.vmem_to_hbm [thread:$0]  %s398_s9, 256, %s946_s7, [#allocation4], %s796_s13, %s796_s13, %s797_s14  }
 0x302   :  { %792 = dma.done.wait [#allocation4], 256  }
 0x303   :  { %793 = vsyncadd [#allocation4], 4294967040 }
 0x304   :  { %407 = vsyncpa [#allocation3], 1 }
 0x305   :  { %408 = vsyncpa [#allocation6], 1 }
 0x306   :  { %409 = vsyncpa [#allocation9], 1 }
 0x307   :  { %410 = vsyncpa [#allocation4], 1 }

</bundles_post_ra>
